<compile_context>
chip_gen: v5e
topology: v5e:2x2
jax: 0.10.0
libtpu: 0.0.40
codegen_flags: <defaults>
</compile_context>

<pallas_src>
import jax
import jax.numpy as jnp
from jax.experimental import pallas as pl
from jax.experimental.pallas import tpu as pltpu


def _vmem_capacity_bytes():
    """Physical VMEM per TensorCore; conservative (v7x, 64 MiB) fallback."""
    try:
        return int(pltpu.get_tpu_info().vmem_capacity_bytes)
    except Exception:
        return 64 * 1024 * 1024


def _block_bytes(Bt, S, Din, H, O, compute_dtype):
    """Estimated VMEM for one grid step (double-buffered blocks + live temps)."""
    ce = jnp.dtype(compute_dtype).itemsize
    rows = Bt * S
    x_blk = 2 * rows * Din * 4                 # f32 x block, double-buffered
    out_blk = 2 * Bt * O * S * 4               # f32 out block, double-buffered
    weights = (Din * H + H * O) * ce           # grid-invariant, tiny (not 2x)
    interm = (rows * Din * ce                  # x cast to compute dtype
              + rows * H * 4 + rows * H * ce   # h (f32) + h cast
              + rows * O * 4                   # scores (f32)
              + 2 * O * S * 4)                 # transposed tile + probs (1 batch)
    return x_blk + out_blk + weights + interm


def _pick_batch_block(B, S, Din, H, O, compute_dtype, budget_bytes):
    """Largest batch chunk whose block fits the VMEM budget (target cols =
    Bt*S as large as possible, ideally >=512), preferring an even number of
    grid steps (>=2) so the 'parallel' axis shards across both v7x
    TensorCores; the statically unrolled softmax epilogue is bounded via
    cols <= 4096."""
    divisors = [d for d in range(1, B + 1) if B % d == 0]
    fits = [d for d in divisors
            if _block_bytes(d, S, Din, H, O, compute_dtype) <= budget_bytes] or [1]
    capped = [d for d in fits if d * S <= 4096] or [min(fits)]
    best = max(capped)
    even = [d for d in capped if (B // d) % 2 == 0]     # even num_blocks (>=2)
    if even and 2 * max(even) >= best:                  # give up <=2x block size
        return max(even)
    return best


def self_attention(x, W1, W2, *, batch_block=None, compute_dtype=jnp.bfloat16):
    """Pallas forward of SelfAttention.

    x : (B, S, Din) float32   -- `attention_input`, batch-first (as in PyTorch)
    W1: (H, Din)              -- nn.Linear(Din, H, bias=False).weight
    W2: (O, H)                -- nn.Linear(H, O, bias=False).weight
    returns (B, O, S) float32, softmax over the last axis (S).
    """
    B, S, Din = x.shape
    H = W1.shape[0]
    O = W2.shape[0]

    if x.dtype != jnp.float32:
        x = x.astype(jnp.float32)
    # Tiny weight transposes/casts (Din*H, H*O elements) done once in XLA.
    w1t = jnp.asarray(W1).T.astype(compute_dtype)   # (Din, H)
    w2t = jnp.asarray(W2).T.astype(compute_dtype)   # (H, O)

    # ---- generation-aware block sizing -----------------------------------
    cap = _vmem_capacity_bytes()
    block_budget = int(0.4 * cap)        # ~25 MiB on v7x, ~51 MiB on v5e/v6e
    if batch_block is None:
        Bt = _pick_batch_block(B, S, Din, H, O, compute_dtype, block_budget)
    else:
        Bt = batch_block
        assert B % Bt == 0, "batch_block must divide the batch"
    num_blocks = B // Bt

    blk = _block_bytes(Bt, S, Din, H, O, compute_dtype)
    vmem_limit = int(min(max(int(blk * 1.3), 8 * 1024 * 1024), int(0.8 * cap)))

    def kernel(x_ref, w1_ref, w2_ref, o_ref):
        # x_ref : (Bt, S, Din) f32   -- native layout; cast to bf16 on the VPU
        # w1_ref: (Din, H)  compute dtype (W1^T), grid-invariant
        # w2_ref: (H, O)    compute dtype (W2^T), grid-invariant
        # o_ref : (Bt, O, S) f32     -- final layout, no wrapper epilogue
        # S is normally a multiple of 8, so merging (Bt, S) is layout-preserving.
        xb = x_ref[...].reshape(Bt * S, Din).astype(compute_dtype)
        h = jnp.tanh(jnp.dot(xb, w1_ref[...],
                             preferred_element_type=jnp.float32))        # (Bt*S, H)
        s = jnp.dot(h.astype(compute_dtype), w2_ref[...],
                    preferred_element_type=jnp.float32)                  # (Bt*S, O)
        # Per-batch epilogue: one small XLU transpose of the narrow result,
        # lane-axis softmax, direct store into this batch element's output
        # slice (no concatenate; live range bounded to one segment).
        for b in range(Bt):                               # static unroll, Bt small
            st = s[b * S:(b + 1) * S, :].T                # (O, S)
            m = jnp.max(st, axis=-1, keepdims=True)
            e = jnp.exp(st - m)
            l = jnp.sum(e, axis=-1, keepdims=True)
            # Exact normalization for PyTorch parity; pl.reciprocal(approx=True)
            # would use the EUP fast path at ~1e-3 row-sum error.
            o_ref[b] = (e * pl.reciprocal(l, approx=False)).astype(o_ref.dtype)

    out = pl.pallas_call(
        kernel,
        out_shape=jax.ShapeDtypeStruct((B, O, S), jnp.float32),
        grid_spec=pltpu.PrefetchScalarGridSpec(
            num_scalar_prefetch=0,
            grid=(num_blocks,),
            in_specs=[
                # (S, Din) / (Din, H) / (H, O) / (O, S) blocks all cover the
                # full last-two array dims, so the (8, 128) rule is satisfied.
                pl.BlockSpec((Bt, S, Din), lambda i: (i, 0, 0)),   # batch chunk of x
                pl.BlockSpec((Din, H), lambda i: (0, 0)),          # grid-invariant W1^T
                pl.BlockSpec((H, O), lambda i: (0, 0)),            # grid-invariant W2^T
            ],
            out_specs=pl.BlockSpec((Bt, O, S), lambda i: (i, 0, 0)),
        ),
        compiler_params=pltpu.CompilerParams(
            dimension_semantics=("parallel",),   # batch chunks -> both v7x TCs
            vmem_limit_bytes=vmem_limit,
        ),
    )(x, w1t, w2t)
    return out


def reference(x, W1, W2, compute_dtype=jnp.float32):
    """Pure-JAX reference matching the PyTorch forward.

    With compute_dtype=bf16 it mirrors the kernel's mixed-precision path
    (bf16 matmul inputs, f32 accumulation, f32 softmax).
    """
    xc = x.astype(compute_dtype)
    w1c = W1.astype(compute_dtype)
    w2c = W2.astype(compute_dtype)
    h = jnp.tanh(jnp.einsum("bsd,hd->bsh", xc, w1c,
                            preferred_element_type=jnp.float32))
    s = jnp.einsum("bsh,oh->bso", h.astype(compute_dtype), w2c,
                   preferred_element_type=jnp.float32)
    return jax.nn.softmax(jnp.transpose(s, (0, 2, 1)), axis=2)


if __name__ == "__main__":
    # Small shapes consistent with the module's forward.
    B, S = 4, 64
    input_size, hidden_size, output_size = 32, 32, 4

    key = jax.random.PRNGKey(0)
    kx, k1, k2 = jax.random.split(key, 3)

    x = jax.random.normal(kx, (B, S, input_size), dtype=jnp.float32)

    # Deterministic "weights" mimicking nn.Linear(in, out, bias=False).weight
    # of shape (out, in) -- kept in PyTorch orientation.
    W1 = (jax.random.uniform(k1, (hidden_size, input_size), dtype=jnp.float32)
          - 0.5) * (2.0 / jnp.sqrt(input_size))
    W2 = (jax.random.uniform(k2, (output_size, hidden_size), dtype=jnp.float32)
          - 0.5) * (2.0 / jnp.sqrt(hidden_size))

    out = self_attention(x, W1, W2)   # heuristic picks Bt=2 -> grid=(2,), both TCs
    out = jax.block_until_ready(out)

    ref_bf16 = reference(x, W1, W2, compute_dtype=jnp.bfloat16)
    ref_f32 = reference(x, W1, W2, compute_dtype=jnp.float32)

    assert out.shape == (B, output_size, S), out.shape
    err_matched = float(jnp.max(jnp.abs(out - ref_bf16)))
    err_full = float(jnp.max(jnp.abs(out - ref_f32)))
    assert err_matched < 5e-3, err_matched       # vs same mixed-precision path
    assert err_full < 1.5e-2, err_full           # vs exact f32 PyTorch semantics
    # softmax rows sum to ~1 (exact normalization in-kernel)
    assert jnp.allclose(jnp.sum(out, axis=2), 1.0, atol=1e-3)

    print("KERNEL_OK")
</pallas_src>

<mosaic_0001>
module attributes {stable_mosaic.version = 11 : i64} {
  func.func @kernel(%arg0: i32, %arg1: memref<2x64x32xf32, #tpu.memory_space<vmem>>, %arg2: memref<32x32xbf16, #tpu.memory_space<vmem>>, %arg3: memref<32x4xbf16, #tpu.memory_space<vmem>>, %arg4: memref<2x4x64xf32, #tpu.memory_space<vmem>>) attributes {dimension_semantics = [#tpu.dimension_semantics<parallel>], iteration_bounds = array<i64: 2>, scalar_prefetch = 0 : i64, scratch_operands = 0 : i64, tpu.core_type = #tpu.core_type<tc>, window_params = [{transform_indices = @transform_0, window_bounds = array<i64: 2, 64, 32>}, {pipeline_mode = #tpu.pipeline_mode<synchronous>, transform_indices = @transform_1, window_bounds = array<i64: 32, 32>}, {pipeline_mode = #tpu.pipeline_mode<synchronous>, transform_indices = @transform_2, window_bounds = array<i64: 32, 4>}, {transform_indices = @transform_3, window_bounds = array<i64: 2, 4, 64>}]} {
    %c0 = arith.constant 0 : index
    %c0_0 = arith.constant 0 : index
    %c0_1 = arith.constant 0 : index
    %0 = vector.load %arg1[%c0, %c0_0, %c0_1] : memref<2x64x32xf32, #tpu.memory_space<vmem>>, vector<2x64x32xf32>
    %1 = vector.shape_cast %0 : vector<2x64x32xf32> to vector<128x32xf32>
    %2 = arith.truncf %1 : vector<128x32xf32> to vector<128x32xbf16>
    %c0_2 = arith.constant 0 : index
    %c0_3 = arith.constant 0 : index
    %3 = vector.load %arg2[%c0_2, %c0_3] : memref<32x32xbf16, #tpu.memory_space<vmem>>, vector<32x32xbf16>
    %cst = arith.constant dense<0.000000e+00> : vector<128x32xf32>
    %4 = tpu.matmul %2, %3, %cst {dimension_numbers = #tpu.dot_dimension_numbers<[1], [0], [0], [1], [0, 0, 1, 1], [], []>} : vector<128x32xbf16>, vector<32x32xbf16>, vector<128x32xf32> -> vector<128x32xf32>
    %5 = math.tanh %4 : vector<128x32xf32>
    %6 = arith.truncf %5 : vector<128x32xf32> to vector<128x32xbf16>
    %c0_4 = arith.constant 0 : index
    %c0_5 = arith.constant 0 : index
    %7 = vector.load %arg3[%c0_4, %c0_5] : memref<32x4xbf16, #tpu.memory_space<vmem>>, vector<32x4xbf16>
    %cst_6 = arith.constant dense<0.000000e+00> : vector<128x4xf32>
    %8 = tpu.matmul %6, %7, %cst_6 {dimension_numbers = #tpu.dot_dimension_numbers<[1], [0], [0], [1], [0, 0, 1, 1], [], []>} : vector<128x32xbf16>, vector<32x4xbf16>, vector<128x4xf32> -> vector<128x4xf32>
    %9 = vector.extract_strided_slice %8 {offsets = [0, 0], sizes = [64, 4], strides = [1, 1]} : vector<128x4xf32> to vector<64x4xf32>
    %10 = tpu.transpose %9, [1, 0] : vector<64x4xf32> -> vector<4x64xf32>
    %cst_7 = arith.constant dense<0xFF800000> : vector<4xf32>
    %11 = vector.multi_reduction <maximumf>, %10, %cst_7 [1] : vector<4x64xf32> to vector<4xf32>
    %12 = vector.shape_cast %11 : vector<4xf32> to vector<4x1xf32>
    %13 = vector.broadcast %12 : vector<4x1xf32> to vector<4x64xf32>
    %14 = arith.subf %10, %13 : vector<4x64xf32>
    %15 = math.exp %14 : vector<4x64xf32>
    %cst_8 = arith.constant dense<0.000000e+00> : vector<4xf32>
    %16 = vector.multi_reduction <add>, %15, %cst_8 [1] : vector<4x64xf32> to vector<4xf32>
    %17 = vector.shape_cast %16 : vector<4xf32> to vector<4x1xf32>
    %18 = tpu.reciprocal %17 : vector<4x1xf32> -> vector<4x1xf32>
    %19 = vector.broadcast %18 : vector<4x1xf32> to vector<4x64xf32>
    %20 = arith.mulf %15, %19 : vector<4x64xf32>
    %c0_9 = arith.constant 0 : index
    %c0_10 = arith.constant 0 : index
    %c0_11 = arith.constant 0 : index
    %21 = vector.load %arg4[%c0_9, %c0_10, %c0_11] : memref<2x4x64xf32, #tpu.memory_space<vmem>>, vector<1x4x64xf32>
    %22 = vector.shape_cast %21 : vector<1x4x64xf32> to vector<4x64xf32>
    %23 = vector.shape_cast %20 : vector<4x64xf32> to vector<1x4x64xf32>
    tpu.vector_store %arg4[%c0_9, %c0_10, %c0_11], %23 {strides = array<i32>} : memref<2x4x64xf32, #tpu.memory_space<vmem>>, vector<1x4x64xf32>,
    %24 = vector.extract_strided_slice %8 {offsets = [64, 0], sizes = [64, 4], strides = [1, 1]} : vector<128x4xf32> to vector<64x4xf32>
    %25 = tpu.transpose %24, [1, 0] : vector<64x4xf32> -> vector<4x64xf32>
    %cst_12 = arith.constant dense<0xFF800000> : vector<4xf32>
    %26 = vector.multi_reduction <maximumf>, %25, %cst_12 [1] : vector<4x64xf32> to vector<4xf32>
    %27 = vector.shape_cast %26 : vector<4xf32> to vector<4x1xf32>
    %28 = vector.broadcast %27 : vector<4x1xf32> to vector<4x64xf32>
    %29 = arith.subf %25, %28 : vector<4x64xf32>
    %30 = math.exp %29 : vector<4x64xf32>
    %cst_13 = arith.constant dense<0.000000e+00> : vector<4xf32>
    %31 = vector.multi_reduction <add>, %30, %cst_13 [1] : vector<4x64xf32> to vector<4xf32>
    %32 = vector.shape_cast %31 : vector<4xf32> to vector<4x1xf32>
    %33 = tpu.reciprocal %32 : vector<4x1xf32> -> vector<4x1xf32>
    %34 = vector.broadcast %33 : vector<4x1xf32> to vector<4x64xf32>
    %35 = arith.mulf %30, %34 : vector<4x64xf32>
    %c1 = arith.constant 1 : index
    %c0_14 = arith.constant 0 : index
    %c0_15 = arith.constant 0 : index
    %36 = vector.load %arg4[%c1, %c0_14, %c0_15] : memref<2x4x64xf32, #tpu.memory_space<vmem>>, vector<1x4x64xf32>
    %37 = vector.shape_cast %36 : vector<1x4x64xf32> to vector<4x64xf32>
    %38 = vector.shape_cast %35 : vector<4x64xf32> to vector<1x4x64xf32>
    tpu.vector_store %arg4[%c1, %c0_14, %c0_15], %38 {strides = array<i32>} : memref<2x4x64xf32, #tpu.memory_space<vmem>>, vector<1x4x64xf32>,
    return
  }
  func.func @transform_0(%arg0: i32) -> (i32, i32, i32) {
    %c0_i32 = arith.constant 0 : i32
    %c0_i32_0 = arith.constant 0 : i32
    %c0_i32_1 = arith.constant 0 : i32
    return %arg0, %c0_i32, %c0_i32_0 : i32, i32, i32
  }
  func.func @transform_1(%arg0: i32) -> (i32, i32) {
    %c0_i32 = arith.constant 0 : i32
    %c0_i32_0 = arith.constant 0 : i32
    %c0_i32_1 = arith.constant 0 : i32
    return %c0_i32, %c0_i32_0 : i32, i32
  }
  func.func @transform_2(%arg0: i32) -> (i32, i32) {
    %c0_i32 = arith.constant 0 : i32
    %c0_i32_0 = arith.constant 0 : i32
    %c0_i32_1 = arith.constant 0 : i32
    return %c0_i32, %c0_i32_0 : i32, i32
  }
  func.func @transform_3(%arg0: i32) -> (i32, i32, i32) {
    %c0_i32 = arith.constant 0 : i32
    %c0_i32_0 = arith.constant 0 : i32
    %c0_i32_1 = arith.constant 0 : i32
    return %arg0, %c0_i32, %c0_i32_0 : i32, i32, i32
  }
}

</mosaic_0001>

<bundles_post_ra>
// kernel: tpu_custom_call.1
= control target key start
LH: loop header
LB: loop body
LE: loop exit
PB: predicated region body
PF: predicated region fallthrough
CT: control target
= control target key end

     0   :  { %8 = vsyncpa [#allocation3], 0  ;;  %s943_s0 = inlined_call_operand.vmem [shape: f32[4,64,32], index: 0, kind: input, shape index: {}]   ;;  %s944_s1 = inlined_call_operand.vmem [shape: bf16[32,32], index: 1, kind: input, shape index: {}]   ;;  %s945_s2 = inlined_call_operand.vmem [shape: bf16[32,4], index: 2, kind: input, shape index: {}]   ;;  %s946_s3 = inlined_call_operand.hbm [shape: f32[4,4,64], index: 3, kind: output, shape index: {}]  }
   0x1   :  { %10 = vsyncpa [#allocation3 + $0x1], 0  ;;  %s821_s12 = smov 0   ;;  %s823_s13 = smov 0  }
   0x2   :  { %s825_s14 = smov 0   ;;  %s827_s15 = smov 0  }
   0x3 LB: > { %s842_s16 = sadd.s32 4294967295, %s797_s15   ;;  %s597_s17 = sadd.s32 4294967294, %s797_s15   ;;  %s797_s15 = sphi %s827_s15, %s952_s15   ;;  %s793_s14 = sphi %s825_s14, %s951_s14   ;;  %s789_s13 = sphi %s823_s13, %s950_s13   ;;  %s785_s12 = sphi %s821_s12, %s949_s12  }
   0x4   : > { %s846_s18 = sadd.s32 1, %s797_s15   ;;  %s91_s19 = sadd.s32 1, %s793_s14 }
   0x5   : > { %s88_s20 = ssub.s32 %s797_s15, %s846_s18  ;;  %p101_p0 = scmp.ne.s32.totalorder %s793_s14, %s789_s13 }
   0x6   : > { %p89_p1 = scmp.eq.s32.totalorder %s88_s20, 0  ;;  %p102_p2 = scmp.eq.s32.totalorder %s842_s16, 1 }
   0x7   : > { %p107_p3 = scmp.ne.s32.totalorder %s789_s13, %s785_s12  ;;  %p108_p4 = scmp.eq.s32.totalorder %s597_s17, 1 }
   0x8   : > { %s857_s21 = scalar_select %p89_p1, %s793_s14, %s91_s19  }
   0x9   : > { %p859_p5 = por %p102_p2, %p101_p0  ;;  %p863_p6 = por %p108_p4, %p107_p3 }
   0xa   : > { %p600_p7 = scmp.ge.s32.totalorder %s797_s15, 1  ;;  %p142_p8 = scmp.lt.s32.totalorder %s797_s15, 3 }
   0xc   : > { %p143_p9 = pnand %p600_p7, %p142_p8 }
   0xd   : > { %s602_s26 = sshll.u32 (!%p143_p9), %s842_s16, 1  ;;  %s164_s10 = sand.u32 (!%p143_p9), 1, %s789_s13  }
   0xe   : > { %146 = sbr.rel (%p143_p9) target bundleno = 741 (0x2e5), region = 32  ;;  %p168_p10 = scmp.lt.s32.totalorder (!%p143_p9), %s602_s26, 3 }
   0xf   : > { %s601_s11 = sshll.u32 (!%p143_p9), %s164_s10, 3  ;;  %s648_s19 = sshll.u32 (!%p143_p9), %s842_s16, 3 }
  0x10   : > { %s166_s17 = scalar_lea.vmem (!%p143_p9), [#allocation2], %s601_s11  ;;  %s531_s25 = scalar_lea.hbm (!%p143_p9), %s946_s3, %s648_s19 }
  0x11   : > { %s534_s27 = sshll.u32 (!%p143_p9), %s531_s25, 4  ;;  %s520_s16 = scalar_lea.sflag (!%p143_p9), [#allocation3], %s164_s10  ;;  %s535_s27 = int_to_ptr.hbm [resolvable:$true] %s534_s27 }
  0x12   : > { %s749_s28 = sshra.s32 (!%p143_p9), %s535_s27, 4  ;;  %s750_s28 = int_to_ptr.hbm [resolvable:$true] %s749_s28 }
  0x13   : > { %v645_v0 = vld [vmem:[%s944_s1 + $0x8] sm:$0xff]  ;;  %v644_v1 = vld [vmem:[%s944_s1] sm:$0xff]  ;;  %s954_s26 = smov (!%p168_p10, %s602_s26), 3  ;;  %vm216_vm0 = vcmask 261120   ;;  %vm435_vm1 = vcmask 519168   ;;  %p756_p0 = scmp.lt.s32.totalorder %s750_s28, %s946_s3 }
  0x14   : > { %247 = vmatpush.bf16.msra.mxu0 %v645_v0  ;;  %649 = vmatpush.bf16.msra.mxu2 %v645_v0  ;;  %s643_s29 = sshll.u32 %s954_s26, 6  ;;  %v647_v26 = vld [vmem:[%s945_s2 + $0x8] sm:$0xff]  ;;  %v646_v27 = vld [vmem:[%s945_s2] sm:$0xff]  ;;  %s532_s26 = sshll.u32 %s166_s17, 4  ;;  %s533_s26 = int_to_ptr.vmem [resolvable:$true] %s532_s26 }
  0x15   : > { %s172_s5 = scalar_lea.vmem %s943_s0, %s643_s29  ;;  %360 = vmatpush.bf16.msra.mxu1 %v647_v26  ;;  %651 = vmatpush.bf16.msra.mxu3 %v647_v26  ;;  %s751_s29 = scalar_lea.hbm %s750_s28, 8 }
  0x16   : > { %v176_v2 = vld [vmem:[%s172_s5] sm:$0xff]  ;;  %v177_v3 = vld [vmem:[%s172_s5 + $0x8] sm:$0xff]  ;;  %v178_v8 = vld [vmem:[%s172_s5 + $0x10] sm:$0xff]  ;;  %p752_p11 = scmp.ne.s32.totalorder %s750_s28, %s751_s29 }
  0x17   : > { %v184_v4 = vld [vmem:[%s172_s5 + $0x40] sm:$0xff]  ;;  %v192_v5 = vpack.c.bf16 %v177_v3, %v176_v2  ;;  %v185_v6 = vld [vmem:[%s172_s5 + $0x48] sm:$0xff]  ;;  %v179_v9 = vld [vmem:[%s172_s5 + $0x18] sm:$0xff] }
  0x18   : > { %248 = vmatpush.bf16.msra.mxu0 %v644_v1  ;;  %650 = vmatpush.bf16.msra.mxu2 %v644_v1  ;;  %v196_v7 = vpack.c.bf16 %v185_v6, %v184_v4  ;;  %v186_v10 = vld [vmem:[%s172_s5 + $0x50] sm:$0xff]  ;;  %v187_v11 = vld [vmem:[%s172_s5 + $0x58] sm:$0xff]  ;;  %v193_v12 = vpack.c.bf16 %v179_v9, %v178_v8  ;;  %v180_v14 = vld [vmem:[%s172_s5 + $0x20] sm:$0xff]  ;;  %p753_p12 = pnand %p752_p11, %p859_p5 }
  0x19   : > { %v197_v13 = vpack.c.bf16 %v187_v11, %v186_v10  ;;  %v181_v15 = vld [vmem:[%s172_s5 + $0x28] sm:$0xff]  ;;  %v188_v16 = vld [vmem:[%s172_s5 + $0x60] sm:$0xff]  ;;  %v182_v20 = vld [vmem:[%s172_s5 + $0x30] sm:$0xff]  ;;  %361 = vmatpush.bf16.msra.mxu1 %v646_v27  ;;  %652 = vmatpush.bf16.msra.mxu3 %v646_v27 }
  0x1a   : > { %v189_v17 = vld [vmem:[%s172_s5 + $0x68] sm:$0xff]  ;;  %v194_v18 = vpack.c.bf16 %v181_v15, %v180_v14  ;;  %v183_v21 = vld [vmem:[%s172_s5 + $0x38] sm:$0xff]  ;;  %v190_v22 = vld [vmem:[%s172_s5 + $0x70] sm:$0xff]  ;;  %p754_p13 = pneg %p753_p12 }
  0x1b   : > { %613 = vmatmul.msk.bf16.vlgmr.msra.gmra.mxu0 %vm216_vm0, %v192_v5  ;;  %617 = vmatmul.msk.bf16.vlgmr.msra.gmra.mxu2 %vm216_vm0, %v196_v7  ;;  %v198_v19 = vpack.c.bf16 %v189_v17, %v188_v16  ;;  %v191_v23 = vld [vmem:[%s172_s5 + $0x78] sm:$0xff]  ;;  %v195_v24 = vpack.c.bf16 %v183_v21, %v182_v20  ;;  %s755_s5 = scalar_lea.hbm %s946_s3, 16 }
  0x1c   : > { %v199_v25 = vpack.c.bf16 %v191_v23, %v190_v22  ;;  %p757_p1 = scmp.lt.s32.totalorder %s755_s5, %s751_s29 }
  0x1e   : > { %p758_p2 = por %p757_p1, %p756_p0 }
  0x20   : > { %p759_p3 = pnand %p758_p2, %p754_p13 }
  0x2b   : > { %614 = vmatmul.msk.bf16.gmra.mxu0 %vm216_vm0, %v193_v12  ;;  %618 = vmatmul.msk.bf16.gmra.mxu2 %vm216_vm0, %v197_v13 }
  0x3b   : > { %615 = vmatmul.msk.bf16.gmra.mxu0 %vm216_vm0, %v194_v18  ;;  %619 = vmatmul.msk.bf16.gmra.mxu2 %vm216_vm0, %v198_v19 }
  0x4b   : > { %616 = vmatmul.msk.bf16.gmra.mxu0 %vm216_vm0, %v195_v24  ;;  %620 = vmatmul.msk.bf16.gmra.mxu2 %vm216_vm0, %v199_v25 }
  0x98   : > { %v250_v28 = vpop.f32.mrf.mxu0 }
  0x99   : > { %695 = vtanh.f32 %v250_v28 }
  0x9e   : > { %v270_v29 = vpop.f32.mrf.mxu2 }
  0x9f   : > { %v696_v31 = vpop.eup %695 }
  0xa0   : > { %v252_v30 = vpop.f32.mrf.mxu0 }
  0xa1   : > { %697 = vtanh.f32 %v252_v30 }
  0xa2   : > { %699 = vtanh.f32 %v270_v29 }
  0xa6   : > { %v272_v33 = vpop.f32.mrf.mxu2 }
  0xa7   : > { %v698_v32 = vpop.eup %697  ;;  %701 = vtanh.f32 %v272_v33 }
  0xa8   : > { %v255_v34 = vpop.f32.mrf.mxu0  ;;  %v306_v35 = vpack.c.bf16 %v698_v32, %v696_v31  ;;  %v700_v36 = vpop.eup %699 }
  0xa9   : > { %703 = vtanh.f32 %v255_v34 }
  0xaa   : > { %629 = vmatmul.msk.bf16.vlgmr.msra.gmra.mxu1 %vm216_vm0, %v306_v35 }
  0xad   : > { %v702_v37 = vpop.eup %701 }
  0xae   : > { %v275_v38 = vpop.f32.mrf.mxu2  ;;  %v310_v39 = vpack.c.bf16 %v702_v37, %v700_v36 }
  0xaf   : > { %v704_v41 = vpop.eup %703 }
  0xb0   : > { %v257_v40 = vpop.f32.mrf.mxu0  ;;  %633 = vmatmul.msk.bf16.vlgmr.msra.gmra.mxu3 %vm216_vm0, %v310_v39 }
  0xb1   : > { %705 = vtanh.f32 %v257_v40 }
  0xb2   : > { %707 = vtanh.f32 %v275_v38 }
  0xb6   : > { %v277_v43 = vpop.f32.mrf.mxu2 }
  0xb7   : > { %v706_v42 = vpop.eup %705  ;;  %709 = vtanh.f32 %v277_v43 }
  0xb8   : > { %v260_v44 = vpop.f32.mrf.mxu0  ;;  %v307_v45 = vpack.c.bf16 %v706_v42, %v704_v41  ;;  %v708_v46 = vpop.eup %707 }
  0xb9   : > { %711 = vtanh.f32 %v260_v44 }
  0xba   : > { %630 = vmatmul.msk.bf16.gmra.mxu1 %vm216_vm0, %v307_v45 }
  0xbd   : > { %v710_v47 = vpop.eup %709 }
  0xbe   : > { %v280_v48 = vpop.f32.mrf.mxu2  ;;  %v311_v49 = vpack.c.bf16 %v710_v47, %v708_v46 }
  0xbf   : > { %v712_v51 = vpop.eup %711 }
  0xc0   : > { %v262_v50 = vpop.f32.mrf.mxu0  ;;  %634 = vmatmul.msk.bf16.gmra.mxu3 %vm216_vm0, %v311_v49 }
  0xc1   : > { %713 = vtanh.f32 %v262_v50 }
  0xc2   : > { %715 = vtanh.f32 %v280_v48 }
  0xc6   : > { %v282_v53 = vpop.f32.mrf.mxu2 }
  0xc7   : > { %v714_v52 = vpop.eup %713  ;;  %717 = vtanh.f32 %v282_v53 }
  0xc8   : > { %v265_v54 = vpop.f32.mrf.mxu0  ;;  %v308_v55 = vpack.c.bf16 %v714_v52, %v712_v51  ;;  %v716_v56 = vpop.eup %715 }
  0xc9   : > { %719 = vtanh.f32 %v265_v54 }
  0xca   : > { %631 = vmatmul.msk.bf16.gmra.mxu1 %vm216_vm0, %v308_v55 }
  0xcd   : > { %v718_v57 = vpop.eup %717 }
  0xce   : > { %v285_v58 = vpop.f32.mrf.mxu2  ;;  %v312_v59 = vpack.c.bf16 %v718_v57, %v716_v56 }
  0xcf   : > { %v720_v61 = vpop.eup %719 }
  0xd0   : > { %v267_v60 = vpop.f32.mrf.mxu0  ;;  %635 = vmatmul.msk.bf16.gmra.mxu3 %vm216_vm0, %v312_v59 }
  0xd1   : > { %721 = vtanh.f32 %v267_v60 }
  0xd2   : > { %723 = vtanh.f32 %v285_v58 }
  0xd6   : > { %v287_v63 = vpop.f32.mrf.mxu2 }
  0xd7   : > { %v722_v62 = vpop.eup %721  ;;  %725 = vtanh.f32 %v287_v63 }
  0xd8   : > { %v309_v0 = vpack.c.bf16 %v722_v62, %v720_v61  ;;  %v724_v1 = vpop.eup %723 }
  0xda   : > { %632 = vmatmul.msk.bf16.gmra.mxu1 %vm216_vm0, %v309_v0 }
  0xdd   : > { %v726_v2 = vpop.eup %725 }
  0xde   : > { %v313_v3 = vpack.c.bf16 %v726_v2, %v724_v1 }
  0xe0   : > { %636 = vmatmul.msk.bf16.gmra.mxu3 %vm216_vm0, %v313_v3 }
 0x127   : > { %v363_v4 = vpop.f32.mrf.mxu1 }
 0x128   : > { %403 = vxpose.xlu0.b32.start [1/8] (short) (narrow) %v363_v4, 8 }
 0x12f   : > { %v365_v5 = vpop.f32.mrf.mxu1 }
 0x130   : > { %404 = vxpose.xlu0.b32.cont [2/8] (short) (narrow) %v365_v5, 8 }
 0x133   : > { %v383_v6 = vpop.f32.mrf.mxu3 }
 0x134   : > { %461 = vxpose.xlu1.b32.start [1/8] (short) (narrow) %v383_v6, 8 }
 0x137   : > { %v368_v7 = vpop.f32.mrf.mxu1 }
 0x138   : > { %405 = vxpose.xlu0.b32.cont [3/8] (short) (narrow) %v368_v7, 8 }
 0x13b   : > { %v385_v8 = vpop.f32.mrf.mxu3 }
 0x13c   : > { %462 = vxpose.xlu1.b32.cont [2/8] (short) (narrow) %v385_v8, 8 }
 0x13f   : > { %v370_v9 = vpop.f32.mrf.mxu1 }
 0x140   : > { %406 = vxpose.xlu0.b32.cont [4/8] (short) (narrow) %v370_v9, 8 }
 0x143   : > { %v388_v10 = vpop.f32.mrf.mxu3 }
 0x144   : > { %463 = vxpose.xlu1.b32.cont [3/8] (short) (narrow) %v388_v10, 8 }
 0x147   : > { %v373_v11 = vpop.f32.mrf.mxu1 }
 0x148   : > { %407 = vxpose.xlu0.b32.cont [5/8] (short) (narrow) %v373_v11, 8 }
 0x14b   : > { %v390_v12 = vpop.f32.mrf.mxu3 }
 0x14c   : > { %464 = vxpose.xlu1.b32.cont [4/8] (short) (narrow) %v390_v12, 8 }
 0x14f   : > { %v375_v13 = vpop.f32.mrf.mxu1 }
 0x150   : > { %408 = vxpose.xlu0.b32.cont [6/8] (short) (narrow) %v375_v13, 8 }
 0x153   : > { %v393_v14 = vpop.f32.mrf.mxu3 }
 0x154   : > { %465 = vxpose.xlu1.b32.cont [5/8] (short) (narrow) %v393_v14, 8 }
 0x157   : > { %v378_v15 = vpop.f32.mrf.mxu1 }
 0x158   : > { %409 = vxpose.xlu0.b32.cont [7/8] (short) (narrow) %v378_v15, 8 }
 0x15b   : > { %v395_v16 = vpop.f32.mrf.mxu3 }
 0x15c   : > { %466 = vxpose.xlu1.b32.cont [6/8] (short) (narrow) %v395_v16, 8 }
 0x15f   : > { %v380_v17 = vpop.f32.mrf.mxu1 }
 0x160   : > { %410 = vxpose.xlu0.b32.end [8/8] (short) (narrow) %v380_v17, 8 }
 0x163   : > { %v398_v18 = vpop.f32.mrf.mxu3 }
 0x164   : > { %467 = vxpose.xlu1.b32.cont [7/8] (short) (narrow) %v398_v18, 8 }
 0x16b   : > { %v400_v19 = vpop.f32.mrf.mxu3 }
 0x16c   : > { %468 = vxpose.xlu1.b32.end [8/8] (short) (narrow) %v400_v19, 8 }
 0x1cc   : > { %v419_v20 = vpop.trf.xlu0 }
 0x1cd   : > { %v436_v21 = vsel %vm435_vm1, %v419_v20, -inf }
 0x1ce   : > { %437 = vmax.xlane.f32.xlu2 %v436_v21 }
 0x1d8   : > { %v477_v22 = vpop.trf.xlu1 }
 0x1d9   : > { %v493_v23 = vsel %vm435_vm1, %v477_v22, -inf }
 0x1da   : > { %494 = vmax.xlane.f32.xlu2 %v493_v23 }
 0x241   : > { %v438_v24 = vpop.xlane.xlu2 %437 }
 0x242   : > { %v439_v25 = vsub.f32 %v419_v20, %v438_v24 }
 0x244   : > { %v440_v26 = vmul.f32 1.442695, %v439_v25 }
 0x246   : > { %727 = vpow2.f32 %v440_v26 }
 0x24c   : > { %v728_v27 = vpop.eup %727 }
 0x24d   : > { %v442_v28 = vsel %vm435_vm1, %v728_v27, 0.0  ;;  %v495_v29 = vpop.xlane.xlu2 %494 }
 0x24e   : > { %443 = vadd.xlane.f32.xlu2 %v442_v28  ;;  %v496_v30 = vsub.f32 %v477_v22, %v495_v29 }
 0x250   : > { %v497_v31 = vmul.f32 1.442695, %v496_v30 }
 0x252   : > { %729 = vpow2.f32 %v497_v31 }
 0x258   : > { %v730_v32 = vpop.eup %729 }
 0x259   : > { %v499_v33 = vsel %vm435_vm1, %v730_v32, 0.0 }
 0x25a   : > { %500 = vadd.xlane.f32.xlu2 %v499_v33 }
 0x2c1   : > { %v444_v34 = vpop.xlane.xlu2 %443 }
 0x2c2   : > { %731 = vrcp.f32 %v444_v34  ;;  %v456_v38 = vand.u32 2147483648, %v444_v34  ;;  %v454_v40 = vand.u32 2147483647, %v444_v34  ;;  %vm450_vm3 = vweird.f32 %v444_v34 }
 0x2c4   : > { %v457_v43 = vor.u32 1.1754944e-38, %v456_v38  ;;  %vm455_vm5 = vcmp.eq.f32.partialorder %v454_v40, 8.507059e+37 }
 0x2c8   : > { %v732_v35 = vpop.eup %731 }
 0x2c9   : > { %v446_v36 = vmul.f32 %v732_v35, %v444_v34  ;;  %vm451_vm2 = vweird.f32 %v732_v35 }
 0x2ca   : > { %vm452_vm4 = vmor %vm450_vm3, %vm451_vm2 }
 0x2cb   : > { %v447_v37 = vsub.f32 1.0, %v446_v36 }
 0x2cd   : > { %v448_v39 = vmul.f32 %v732_v35, %v447_v37  ;;  %v501_v41 = vpop.xlane.xlu2 %500 }
 0x2ce   : > { %733 = vrcp.f32 %v501_v41  ;;  %v513_v50 = vand.u32 2147483648, %v501_v41  ;;  %v511_v52 = vand.u32 2147483647, %v501_v41  ;;  %vm507_vm7 = vweird.f32 %v501_v41 }
 0x2cf   : > { %v449_v42 = vadd.f32 %v732_v35, %v448_v39 }
 0x2d0   : > { %v514_v54 = vor.u32 1.1754944e-38, %v513_v50  ;;  %vm512_vm9 = vcmp.eq.f32.partialorder %v511_v52, 8.507059e+37 }
 0x2d1   : > { %v453_v44 = vsel %vm452_vm4, %v732_v35, %v449_v42 }
 0x2d2   : > { %v458_v45 = vsel %vm455_vm5, %v457_v43, %v453_v44 }
 0x2d3   : > { %v459_v46 = vmul.f32 %v728_v27, %v458_v45 }
 0x2d4   : > { %v734_v47 = vpop.eup %733 }
 0x2d5   : > { %460 = vst.msk [vmem:[%s166_s17] sm:$0xf] %vm435_vm1, %v459_v46  ;;  %v503_v48 = vmul.f32 %v734_v47, %v501_v41  ;;  %vm508_vm6 = vweird.f32 %v734_v47 }
 0x2d6   : > { %vm509_vm8 = vmor %vm507_vm7, %vm508_vm6 }
 0x2d7   : > { %v504_v49 = vsub.f32 1.0, %v503_v48 }
 0x2d9   : > { %v505_v51 = vmul.f32 %v734_v47, %v504_v49 }
 0x2db   : > { %v506_v53 = vadd.f32 %v734_v47, %v505_v51 }
 0x2dd   : > { %v510_v55 = vsel %vm509_vm8, %v734_v47, %v506_v53 }
 0x2de   : > { %v515_v56 = vsel %vm512_vm9, %v514_v54, %v510_v55 }
 0x2df   : > { %v516_v57 = vmul.f32 %v730_v32, %v515_v56 }
 0x2e1   : > { %637 = vst.msk [vmem:[%s166_s17 + $0x4] sm:$0xf] %vm435_vm1, %v516_v57 }
 0x2e2   : > { %762 = shalt.err (!%p759_p3)
}
 0x2e3   : > { %s799_s8 = smov 64   ;;  %s800_s9 = smov 4  }
 0x2e4   : > { %653 = dma.vmem_to_hbm [thread:$0]  (%p859_p5), %s533_s26, 128, %s535_s27, %s520_s16, %s799_s8, %s799_s8, %s800_s9  }
 0x2e5 PF: > { %p659_p4 = scmp.ge.s32.totalorder %s797_s15, 2  ;;  %s549_s10 = sand.u32 1, %s785_s12  }
 0x2e6   : > { %s550_s11 = scalar_lea.sflag [#allocation3], %s549_s10 }
 0x2e7   : > { %p656_p7 = pnand %p659_p4, %p863_p6 }
 0x2e9   : > { %p657_p8 = pneg %p656_p7 }
 0x2eb   : > { %780 = dma.done.wait (%p657_p8), %s550_s11, 128  }
 0x2ec   : > { %782 = vsyncadd (%p657_p8), %s550_s11, 4294967168  ;;  %p13_p9 = scmp.ge.s32.totalorder %s846_s18, 4   ;;  %s949_s12 = smov %s789_s13 }
 0x2ed   : > { %s950_s13 = smov %s793_s14  ;;  %s951_s14 = smov %s857_s21 }
 0x2ee   : > { %s952_s15 = smov %s846_s18  ;;  %15 = sbr.rel (!%p13_p9) target bundleno = 3 (0x3), region = 68 }
 0x2f3   :  { %556 = vsyncpa [#allocation3], 1 }
 0x2f4   :  { %558 = vsyncpa [#allocation3 + $0x1], 1 }

</bundles_post_ra>
